<compile_context>
chip_gen: v7x
topology: tpu7x:2x2x1
jax: 0.10.0
libtpu: 0.0.40
codegen_flags: <defaults>
</compile_context>

<pallas_src>
import jax
import jax.numpy as jnp
from jax import lax
from jax.experimental import pallas as pl
from jax.experimental.pallas import tpu as pltpu

# ---------------- config (small but lane-dense synthetic shapes) ----------------
T = 32              # num_tokens
H = 256             # hidden_size           (multiple of 128)
I = 128             # intermediate_size     (2*I = 256, multiple of 128)
E = 8               # num_experts
TOPK = 2            # moe_top_k
NSHARED = 1         # num_shared_experts
I_SH = I * NSHARED  # shared-expert intermediate size
TM = 16             # token tile (bf16 sublane packing = 16); leading "parallel" axis

DTYPE = jnp.bfloat16


# ---------------- fused MoE kernel ----------------
def _fused_moe_kernel(ids_ref, nact_ref,                 # scalar prefetch (SMEM)
                      x_ref, gate_ref,                   # per-tile inputs (VMEM)
                      w1_ref, w2_ref, sgu_ref, sd_ref,   # VMEM-resident weights
                      out_ref):                          # output (VMEM)
    x = x_ref[...]                                       # (TM, H) bf16

    def mlp(xv, w_gu, w_d, gate_col=None):
        # bf16 MXU operands, f32 accumulation; SiLU / gating elementwise math in f32.
        gu = jnp.dot(xv, w_gu, preferred_element_type=jnp.float32)   # (TM, 2I)
        i = gu.shape[-1] // 2
        g, u = gu[:, :i], gu[:, i:]
        act = g * jax.nn.sigmoid(g) * u                              # SiluAndMul (f32)
        if gate_col is not None:
            # Apply the per-token routing weight on the (TM, I) activation (half the
            # lanes of gating the (TM, H) output, and no extra f32 temporary).
            act = act * gate_col
        return jnp.dot(act.astype(w_d.dtype), w_d,
                       preferred_element_type=jnp.float32)           # (TM, H) f32

    # Seed the accumulator with the shared-expert output: fuses `final + shared_output`.
    acc0 = mlp(x, sgu_ref[...], sd_ref[...])

    gate_tile = gate_ref[...]                                        # (TM, E) f32
    col_ids = lax.broadcasted_iota(jnp.int32, gate_tile.shape, 1)

    def body(e, acc):
        eid = ids_ref[e]                                             # SMEM scalar read
        # Extract this expert's per-token gate column as (TM, 1).
        g_col = jnp.sum(jnp.where(col_ids == eid, gate_tile, 0.0),
                        axis=1, keepdims=True)
        # Dynamic leading-axis index into the VMEM-resident expert weight stacks.
        return acc + mlp(x, w1_ref[eid], w2_ref[eid], g_col)

    # Only experts that actually received >= 1 token are visited.
    acc = lax.fori_loop(0, nact_ref[0], body, acc0)
    out_ref[...] = acc.astype(out_ref.dtype)


def fused_moe_call(x, gate, active_ids, n_active, w1, w2, sgu, sd):
    Tn, Hn = x.shape
    e, _, two_i = w1.shape
    i_sh = sd.shape[0]
    # VMEM budget (double-buffered defaults): ~2x(w1 + w2 + sgu + sd) ~= 3.5 MiB here.
    # TODO(synk): at real Xverse shapes, single-buffer the constant-index weights
    # (pipeline_mode=pl.Buffered(1)), tile 2I, and set vmem_limit_bytes with headroom.
    return pl.pallas_call(
        _fused_moe_kernel,
        out_shape=jax.ShapeDtypeStruct((Tn, Hn), x.dtype),
        grid_spec=pltpu.PrefetchScalarGridSpec(
            num_scalar_prefetch=2,
            grid=(Tn // TM,),                                          # token tiles only
            in_specs=[
                pl.BlockSpec((TM, Hn), lambda t, ids, n: (t, 0)),      # x
                pl.BlockSpec((TM, e), lambda t, ids, n: (t, 0)),       # gate [T, E]
                pl.BlockSpec((e, Hn, two_i), lambda t, ids, n: (0, 0, 0)),       # w1 stack
                pl.BlockSpec((e, two_i // 2, Hn), lambda t, ids, n: (0, 0, 0)),  # w2 stack
                pl.BlockSpec((Hn, 2 * i_sh), lambda t, ids, n: (0, 0)),          # shared gate_up
                pl.BlockSpec((i_sh, Hn), lambda t, ids, n: (0, 0)),              # shared down
            ],
            out_specs=pl.BlockSpec((TM, Hn), lambda t, ids, n: (t, 0)),
        ),
        compiler_params=pltpu.CompilerParams(
            dimension_semantics=("parallel",)),
    )(active_ids, n_active, x, gate, w1, w2, sgu, sd)


# ---------------- wrapper: router + routing schedule + fused kernel ----------------
def router_topk(hidden_states, w_router):
    # bf16 MXU operands, f32 accumulation (no f32 activation copy before the kernel).
    logits = jnp.dot(hidden_states, w_router, preferred_element_type=jnp.float32)
    probs = jax.nn.softmax(logits, axis=-1)
    return lax.top_k(probs, TOPK)          # norm_topk_prob = False -> no renormalization


def xverse_moe(hidden_states, params):
    Tn, Hn = hidden_states.shape

    # Router + softmax + top-k stay in plain JAX: the routing decision must exist
    # before the pallas_call so it can drive the scalar-prefetched expert schedule.
    # TODO(synk): lax.top_k has no Mosaic lowering; the routing decision stays in JAX.
    topk_w, topk_ids = router_topk(hidden_states, params["w_router"])
    gate_dense = jnp.zeros((Tn, E), jnp.float32).at[
        jnp.arange(Tn)[:, None], topk_ids].set(topk_w)               # [T, E]

    # Compact active-expert schedule (scalar prefetch): active expert ids first; the
    # in-kernel loop runs exactly n_active iterations so padding slots are never read.
    hit = jnp.any(gate_dense > 0.0, axis=0)                          # [E] bool
    n_active = jnp.sum(hit).astype(jnp.int32)
    active_ids = jnp.argsort(jnp.logical_not(hit)).astype(jnp.int32) # active ids first

    # TODO(synk): for large T, replace gate-masked dense compute with token-grouped
    # group-GEMM routing (sorted tokens + group offsets driving x/out index_maps).
    out = fused_moe_call(hidden_states, gate_dense, active_ids, n_active[None],
                         params["w1"], params["w2"],
                         params["shared_w_gu"], params["shared_w_d"])
    # tensor_model_parallel_all_reduce is the identity at tp_size == 1.
    return out


# ---------------- params / reference / main ----------------
def init_params(key):
    ks = jax.random.split(key, 5)
    s = 0.05
    return {
        "w_router": (s * jax.random.normal(ks[0], (H, E), jnp.float32)).astype(DTYPE),
        "w1": (s * jax.random.normal(ks[1], (E, H, 2 * I), jnp.float32)).astype(DTYPE),
        "w2": (s * jax.random.normal(ks[2], (E, I, H), jnp.float32)).astype(DTYPE),
        "shared_w_gu": (s * jax.random.normal(ks[3], (H, 2 * I_SH), jnp.float32)).astype(DTYPE),
        "shared_w_d": (s * jax.random.normal(ks[4], (I_SH, H), jnp.float32)).astype(DTYPE),
    }


def reference_moe(hidden_states, params):
    """Pure-JAX f32 reference of XverseMoE.forward (tp=1), same routing decision."""
    xf = hidden_states.astype(jnp.float32)

    def mlp(x, w_gu, w_d):
        gu = jnp.dot(x, w_gu.astype(jnp.float32))
        i = gu.shape[-1] // 2
        g, u = gu[:, :i], gu[:, i:]
        return jnp.dot(g * jax.nn.sigmoid(g) * u, w_d.astype(jnp.float32))

    shared = mlp(xf, params["shared_w_gu"], params["shared_w_d"])
    topk_w, topk_ids = router_topk(hidden_states, params["w_router"])
    out = shared
    for e in range(E):
        w = jnp.where(topk_ids == e, topk_w, 0.0).sum(-1, keepdims=True)  # [T, 1]
        out = out + w * mlp(xf, params["w1"][e], params["w2"][e])
    return out


if __name__ == "__main__":
    key = jax.random.PRNGKey(0)
    k_x, k_p = jax.random.split(key)
    hidden_states = jax.random.normal(k_x, (T, H), dtype=jnp.float32).astype(DTYPE)
    params = init_params(k_p)

    moe_fn = jax.jit(xverse_moe)
    out = moe_fn(hidden_states, params)
    jax.block_until_ready(out)

    assert out.shape == (T, H)
    assert bool(jnp.all(jnp.isfinite(out)))

    ref = reference_moe(hidden_states, params)
    max_err = float(jnp.max(jnp.abs(out.astype(jnp.float32) - ref)))
    assert max_err < 5e-2, f"max abs error {max_err} too large"

    print("KERNEL_OK")
</pallas_src>

<mosaic_0001>
module attributes {stable_mosaic.version = 11 : i64} {
  func.func @_fused_moe_kernel(%arg0: i32, %arg1: memref<8xi32, #tpu.memory_space<smem>>, %arg2: memref<1xi32, #tpu.memory_space<smem>>, %arg3: memref<16x256xbf16, #tpu.memory_space<vmem>>, %arg4: memref<16x8xf32, #tpu.memory_space<vmem>>, %arg5: memref<8x256x256xbf16, #tpu.memory_space<vmem>>, %arg6: memref<8x128x256xbf16, #tpu.memory_space<vmem>>, %arg7: memref<256x256xbf16, #tpu.memory_space<vmem>>, %arg8: memref<128x256xbf16, #tpu.memory_space<vmem>>, %arg9: memref<16x256xbf16, #tpu.memory_space<vmem>>) attributes {dimension_semantics = [#tpu.dimension_semantics<parallel>], iteration_bounds = array<i64: 2>, scalar_prefetch = 2 : i64, scratch_operands = 0 : i64, tpu.core_type = #tpu.core_type<tc>, window_params = [{transform_indices = @transform_0, window_bounds = array<i64: 16, 256>}, {transform_indices = @transform_1, window_bounds = array<i64: 16, 8>}, {pipeline_mode = #tpu.pipeline_mode<synchronous>, transform_indices = @transform_2, window_bounds = array<i64: 8, 256, 256>}, {pipeline_mode = #tpu.pipeline_mode<synchronous>, transform_indices = @transform_3, window_bounds = array<i64: 8, 128, 256>}, {pipeline_mode = #tpu.pipeline_mode<synchronous>, transform_indices = @transform_4, window_bounds = array<i64: 256, 256>}, {pipeline_mode = #tpu.pipeline_mode<synchronous>, transform_indices = @transform_5, window_bounds = array<i64: 128, 256>}, {transform_indices = @transform_6, window_bounds = array<i64: 16, 256>}]} {
    %c0 = arith.constant 0 : index
    %c0_0 = arith.constant 0 : index
    %0 = vector.load %arg3[%c0, %c0_0] : memref<16x256xbf16, #tpu.memory_space<vmem>>, vector<16x256xbf16>
    %c0_1 = arith.constant 0 : index
    %c0_2 = arith.constant 0 : index
    %1 = vector.load %arg7[%c0_1, %c0_2] : memref<256x256xbf16, #tpu.memory_space<vmem>>, vector<256x256xbf16>
    %c0_3 = arith.constant 0 : index
    %c0_4 = arith.constant 0 : index
    %2 = vector.load %arg8[%c0_3, %c0_4] : memref<128x256xbf16, #tpu.memory_space<vmem>>, vector<128x256xbf16>
    %cst = arith.constant dense<0.000000e+00> : vector<16x256xf32>
    %3 = tpu.matmul %0, %1, %cst {dimension_numbers = #tpu.dot_dimension_numbers<[1], [0], [0], [1], [0, 0, 1, 1], [], []>} : vector<16x256xbf16>, vector<256x256xbf16>, vector<16x256xf32> -> vector<16x256xf32>
    %4 = vector.extract_strided_slice %3 {offsets = [0, 0], sizes = [16, 128], strides = [1, 1]} : vector<16x256xf32> to vector<16x128xf32>
    %5 = vector.extract_strided_slice %3 {offsets = [0, 128], sizes = [16, 128], strides = [1, 1]} : vector<16x256xf32> to vector<16x128xf32>
    %6 = arith.negf %4 : vector<16x128xf32>
    %7 = math.exp %6 : vector<16x128xf32>
    %cst_5 = arith.constant 1.000000e+00 : f32
    %8 = vector.broadcast %cst_5 : f32 to vector<16x128xf32>
    %9 = arith.addf %8, %7 : vector<16x128xf32>
    %10 = arith.divf %8, %9 : vector<16x128xf32>
    %11 = arith.mulf %4, %10 : vector<16x128xf32>
    %12 = arith.mulf %11, %5 : vector<16x128xf32>
    %13 = arith.truncf %12 : vector<16x128xf32> to vector<16x128xbf16>
    %cst_6 = arith.constant dense<0.000000e+00> : vector<16x256xf32>
    %14 = tpu.matmul %13, %2, %cst_6 {dimension_numbers = #tpu.dot_dimension_numbers<[1], [0], [0], [1], [0, 0, 1, 1], [], []>} : vector<16x128xbf16>, vector<128x256xbf16>, vector<16x256xf32> -> vector<16x256xf32>
    %c0_7 = arith.constant 0 : index
    %c0_8 = arith.constant 0 : index
    %15 = vector.load %arg4[%c0_7, %c0_8] : memref<16x8xf32, #tpu.memory_space<vmem>>, vector<16x8xf32>
    %16 = tpu.iota {dimensions = array<i32: 1>} : vector<16x8xi32>
    %c0_9 = arith.constant 0 : index
    %17 = memref.load %arg2[%c0_9] : memref<1xi32, #tpu.memory_space<smem>>
    %c0_i32 = arith.constant 0 : i32
    %18 = arith.subi %17, %c0_i32 : i32
    %19 = arith.addi %c0_i32, %18 : i32
    %c1_i32 = arith.constant 1 : i32
    %20 = scf.for %arg10 = %c0_i32 to %19 step %c1_i32 iter_args(%arg11 = %14) -> (vector<16x256xf32>)  : i32 {
      %23 = arith.index_cast %arg10 : i32 to index
      %24 = memref.load %arg1[%23] : memref<8xi32, #tpu.memory_space<smem>>
      %25 = vector.broadcast %24 : i32 to vector<16x8xi32>
      %26 = arith.cmpi eq, %16, %25 : vector<16x8xi32>
      %cst_12 = arith.constant 0.000000e+00 : f32
      %27 = vector.broadcast %cst_12 : f32 to vector<16x8xf32>
      %28 = arith.select %26, %15, %27 : vector<16x8xi1>, vector<16x8xf32>
      %cst_13 = arith.constant dense<0.000000e+00> : vector<16xf32>
      %29 = vector.multi_reduction <add>, %28, %cst_13 [1] : vector<16x8xf32> to vector<16xf32>
      %30 = vector.shape_cast %29 : vector<16xf32> to vector<16x1xf32>
      %31 = arith.index_cast %24 : i32 to index
      %c0_14 = arith.constant 0 : index
      %c0_15 = arith.constant 0 : index
      %32 = vector.load %arg5[%31, %c0_14, %c0_15] : memref<8x256x256xbf16, #tpu.memory_space<vmem>>, vector<1x256x256xbf16>
      %33 = vector.shape_cast %32 : vector<1x256x256xbf16> to vector<256x256xbf16>
      %34 = arith.index_cast %24 : i32 to index
      %c0_16 = arith.constant 0 : index
      %c0_17 = arith.constant 0 : index
      %35 = vector.load %arg6[%34, %c0_16, %c0_17] : memref<8x128x256xbf16, #tpu.memory_space<vmem>>, vector<1x128x256xbf16>
      %36 = vector.shape_cast %35 : vector<1x128x256xbf16> to vector<128x256xbf16>
      %cst_18 = arith.constant dense<0.000000e+00> : vector<16x256xf32>
      %37 = tpu.matmul %0, %33, %cst_18 {dimension_numbers = #tpu.dot_dimension_numbers<[1], [0], [0], [1], [0, 0, 1, 1], [], []>} : vector<16x256xbf16>, vector<256x256xbf16>, vector<16x256xf32> -> vector<16x256xf32>
      %38 = vector.extract_strided_slice %37 {offsets = [0, 0], sizes = [16, 128], strides = [1, 1]} : vector<16x256xf32> to vector<16x128xf32>
      %39 = vector.extract_strided_slice %37 {offsets = [0, 128], sizes = [16, 128], strides = [1, 1]} : vector<16x256xf32> to vector<16x128xf32>
      %40 = arith.negf %38 : vector<16x128xf32>
      %41 = math.exp %40 : vector<16x128xf32>
      %cst_19 = arith.constant 1.000000e+00 : f32
      %42 = vector.broadcast %cst_19 : f32 to vector<16x128xf32>
      %43 = arith.addf %42, %41 : vector<16x128xf32>
      %44 = arith.divf %42, %43 : vector<16x128xf32>
      %45 = arith.mulf %38, %44 : vector<16x128xf32>
      %46 = arith.mulf %45, %39 : vector<16x128xf32>
      %47 = vector.broadcast %30 : vector<16x1xf32> to vector<16x128xf32>
      %48 = arith.mulf %46, %47 : vector<16x128xf32>
      %49 = arith.truncf %48 : vector<16x128xf32> to vector<16x128xbf16>
      %cst_20 = arith.constant dense<0.000000e+00> : vector<16x256xf32>
      %50 = tpu.matmul %49, %36, %cst_20 {dimension_numbers = #tpu.dot_dimension_numbers<[1], [0], [0], [1], [0, 0, 1, 1], [], []>} : vector<16x128xbf16>, vector<128x256xbf16>, vector<16x256xf32> -> vector<16x256xf32>
      %51 = arith.addf %arg11, %50 : vector<16x256xf32>
      scf.yield %51 : vector<16x256xf32>
    }
    %21 = arith.truncf %20 : vector<16x256xf32> to vector<16x256xbf16>
    %c0_10 = arith.constant 0 : index
    %c0_11 = arith.constant 0 : index
    %22 = vector.load %arg9[%c0_10, %c0_11] : memref<16x256xbf16, #tpu.memory_space<vmem>>, vector<16x256xbf16>
    tpu.vector_store %arg9[%c0_10, %c0_11], %21 {strides = array<i32>} : memref<16x256xbf16, #tpu.memory_space<vmem>>, vector<16x256xbf16>,
    return
  }
  func.func @transform_0(%arg0: i32, %arg1: memref<8xi32, #tpu.memory_space<smem>>, %arg2: memref<1xi32, #tpu.memory_space<smem>>) -> (i32, i32) {
    %c0_i32 = arith.constant 0 : i32
    %c0_i32_0 = arith.constant 0 : i32
    return %arg0, %c0_i32 : i32, i32
  }
  func.func @transform_1(%arg0: i32, %arg1: memref<8xi32, #tpu.memory_space<smem>>, %arg2: memref<1xi32, #tpu.memory_space<smem>>) -> (i32, i32) {
    %c0_i32 = arith.constant 0 : i32
    %c0_i32_0 = arith.constant 0 : i32
    return %arg0, %c0_i32 : i32, i32
  }
  func.func @transform_2(%arg0: i32, %arg1: memref<8xi32, #tpu.memory_space<smem>>, %arg2: memref<1xi32, #tpu.memory_space<smem>>) -> (i32, i32, i32) {
    %c0_i32 = arith.constant 0 : i32
    %c0_i32_0 = arith.constant 0 : i32
    %c0_i32_1 = arith.constant 0 : i32
    %c0_i32_2 = arith.constant 0 : i32
    return %c0_i32, %c0_i32_0, %c0_i32_1 : i32, i32, i32
  }
  func.func @transform_3(%arg0: i32, %arg1: memref<8xi32, #tpu.memory_space<smem>>, %arg2: memref<1xi32, #tpu.memory_space<smem>>) -> (i32, i32, i32) {
    %c0_i32 = arith.constant 0 : i32
    %c0_i32_0 = arith.constant 0 : i32
    %c0_i32_1 = arith.constant 0 : i32
    %c0_i32_2 = arith.constant 0 : i32
    return %c0_i32, %c0_i32_0, %c0_i32_1 : i32, i32, i32
  }
  func.func @transform_4(%arg0: i32, %arg1: memref<8xi32, #tpu.memory_space<smem>>, %arg2: memref<1xi32, #tpu.memory_space<smem>>) -> (i32, i32) {
    %c0_i32 = arith.constant 0 : i32
    %c0_i32_0 = arith.constant 0 : i32
    %c0_i32_1 = arith.constant 0 : i32
    return %c0_i32, %c0_i32_0 : i32, i32
  }
  func.func @transform_5(%arg0: i32, %arg1: memref<8xi32, #tpu.memory_space<smem>>, %arg2: memref<1xi32, #tpu.memory_space<smem>>) -> (i32, i32) {
    %c0_i32 = arith.constant 0 : i32
    %c0_i32_0 = arith.constant 0 : i32
    %c0_i32_1 = arith.constant 0 : i32
    return %c0_i32, %c0_i32_0 : i32, i32
  }
  func.func @transform_6(%arg0: i32, %arg1: memref<8xi32, #tpu.memory_space<smem>>, %arg2: memref<1xi32, #tpu.memory_space<smem>>) -> (i32, i32) {
    %c0_i32 = arith.constant 0 : i32
    %c0_i32_0 = arith.constant 0 : i32
    return %arg0, %c0_i32 : i32, i32
  }
}

</mosaic_0001>

<bundles_post_ra>
// kernel: xverse_moe.1
= control target key start
LH: loop header
LB: loop body
LE: loop exit
PB: predicated region body
PF: predicated region fallthrough
CT: control target
= control target key end

     0   :  { %s2255_s0 = inlined_call_operand.vmem [shape: s32[8], index: 0, kind: input, shape index: {}]   ;;  %s2256_s1 = inlined_call_operand.<no memory space> [shape: s32[1], index: 1, kind: input, shape index: {}]   ;;  %s2257_s2 = inlined_call_operand.vmem [shape: bf16[32,256], index: 2, kind: input, shape index: {}]   ;;  %s2258_s3 = inlined_call_operand.vmem [shape: f32[32,8], index: 3, kind: input, shape index: {}]   ;;  %s2259_s4 = inlined_call_operand.vmem [shape: bf16[8,256,256], index: 4, kind: input, shape index: {}]   ;;  %s2260_s5 = inlined_call_operand.vmem [shape: bf16[8,128,256], index: 5, kind: input, shape index: {}]   ;;  %s2261_s6 = inlined_call_operand.vmem [shape: bf16[256,256], index: 6, kind: input, shape index: {}]   ;;  %s2262_s7 = inlined_call_operand.vmem [shape: bf16[128,256], index: 7, kind: input, shape index: {}]   ;;  %s2263_s8 = inlined_call_operand.hbm [shape: bf16[32,256], index: 8, kind: output, shape index: {}]  }
   0x1   :  { %s13_s29 = sshll.u32 %s2255_s0, 4  ;;  %17 = sst [smem:[#allocation4]] %s2256_s1  ;;  %s14_s29 = int_to_ptr.vmem [resolvable:$true] %s13_s29 }
   0x2   :  { %s1656_s10 = scalar_lea.vmem %s14_s29, 16  ;;  %p1661_p1 = scmp.lt.s32.totalorder %s14_s29, %s14_s29 }
   0x3   :  { %p1657_p0 = scmp.ne.s32.totalorder %s14_s29, %s1656_s10  ;;  %p1662_p2 = scmp.lt.s32.totalorder %s1656_s10, %s1656_s10 }
   0x5   :  { %p1663_p3 = por %p1662_p2, %p1661_p1 }
   0x7   :  { %p1664_p4 = pnand %p1663_p3, %p1657_p0 }
   0x9   :  { %1667 = shalt.err (!%p1664_p4)  }
   0xa   :  { %s1806_s11 = smov [#allocation3]  }
   0xb   :  { %16 = dma.vmem_to_smem %s14_s29, 16, %s1806_s11, [#allocation2] }
   0xc   :  { %1748 = dma.done.wait [#allocation2], 16 }
   0xd   :  { %1749 = vsyncadd [#allocation2], 4294967280 }
   0xe   :  { %19 = sfence }
   0xf   :  { %20 = vsyncpa [#allocation6], 0 }
  0x10   :  { %22 = vsyncpa [#allocation6 + $0x1], 0  ;;  %s1863_s0 = smov 0   ;;  %s1865_s12 = smov 0  }
  0x11   :  { %s1867_s1 = smov 0   ;;  %s1869_s13 = smov 0  }
  0x12 LB: > { %s1884_s14 = sadd.s32 4294967295, %s1768_s13   ;;  %s1245_s15 = sadd.s32 4294967294, %s1768_s13   ;;  %s1768_s13 = sphi %s1869_s13, %s2281_s13   ;;  %s1764_s1 = sphi %s1867_s1, %s2280_s1   ;;  %s1760_s12 = sphi %s1865_s12, %s2279_s12   ;;  %s1756_s0 = sphi %s1863_s0, %s2278_s0  }
  0x13   : > { %s1888_s16 = sadd.s32 1, %s1768_s13   ;;  %s171_s17 = sadd.s32 1, %s1764_s1 }
  0x14   : > { %s168_s18 = ssub.s32 %s1768_s13, %s1888_s16  ;;  %p181_p5 = scmp.ne.s32.totalorder %s1764_s1, %s1760_s12 }
  0x15   : > { %p169_p6 = scmp.eq.s32.totalorder %s168_s18, 0  ;;  %p182_p7 = scmp.eq.s32.totalorder %s1884_s14, 1 }
  0x16   : > { %p187_p8 = scmp.ne.s32.totalorder %s1760_s12, %s1756_s0  ;;  %p188_p9 = scmp.eq.s32.totalorder %s1245_s15, 1 }
  0x17   : > { %s1899_s19 = scalar_select %p169_p6, %s1764_s1, %s171_s17  }
  0x18   : > { %p1901_p10 = por %p182_p7, %p181_p5  ;;  %p1905_p11 = por %p188_p9, %p187_p8 }
  0x19   : > { %p1248_p12 = scmp.ge.s32.totalorder %s1768_s13, 1  ;;  %p237_p13 = scmp.lt.s32.totalorder %s1768_s13, 3 }
  0x1b   : > { %p238_p0 = pnand %p1248_p12, %p237_p13 }
  0x1c   : > { %s270_s22 = sand.u32 (!%p238_p0), 1, %s1760_s12   ;;  %v1493_v0 = vld [vmem:[%s2261_s6 + $0x4] ss:$8 sps:$4 sm:$0xff] (!%p238_p0)   ;;  %v1495_v1 = vld [vmem:[%s2261_s6] ss:$8 sps:$4 sm:$0xff] (!%p238_p0)   ;;  %s1250_s15 = sshll.u32 (!%p238_p0), %s1884_s14, 1 }
  0x1d   : > { %241 = sbr.rel (%p238_p0) target bundleno = 1119 (0x45f), region = 44  ;;  %s1917_s25 = sshll.u32 (!%p238_p0), %s270_s22, 4  ;;  %508 = vmatprep.subr.bf16.mxu0 (!%p238_p0), %v1493_v0  ;;  %v1496_v2 = vld [vmem:[%s2261_s6 + $0x14] ss:$8 sps:$4 sm:$0xff] (!%p238_p0)   ;;  %v1498_v3 = vld [vmem:[%s2261_s6 + $0x10] ss:$8 sps:$4 sm:$0xff] (!%p238_p0)  }
  0x1e   : > { %509 = vmatpush1.bf16.msra.mxu0 (!%p238_p0), %v1495_v1  ;;  %v1499_v4 = vld [vmem:[%s2261_s6 + $0x24] ss:$8 sps:$4 sm:$0xff] (!%p238_p0)   ;;  %v1501_v5 = vld [vmem:[%s2261_s6 + $0x20] ss:$8 sps:$4 sm:$0xff] (!%p238_p0)   ;;  %v1502_v6 = vld [vmem:[%s2261_s6 + $0x34] ss:$8 sps:$4 sm:$0xff] (!%p238_p0)  }
  0x1f   : > { %510 = vmatprep.subr.bf16.mxu0 (!%p238_p0), %v1496_v2  ;;  %p274_p1 = scmp.lt.s32.totalorder (!%p238_p0), %s1250_s15, 3  ;;  %v1504_v7 = vld [vmem:[%s2261_s6 + $0x30] ss:$8 sps:$4 sm:$0xff] (!%p238_p0)   ;;  %v1505_v8 = vld [vmem:[%s2261_s6 + $0x44] ss:$8 sps:$4 sm:$0xff] (!%p238_p0)   ;;  %v1807_v52 = vmov (!%p238_p0), 0  }
  0x20   : > { %v1507_v9 = vld [vmem:[%s2261_s6 + $0x40] ss:$8 sps:$4 sm:$0xff] (!%p238_p0)   ;;  %v1508_v10 = vld [vmem:[%s2261_s6 + $0x54] ss:$8 sps:$4 sm:$0xff] (!%p238_p0)   ;;  %v1510_v11 = vld [vmem:[%s2261_s6 + $0x50] ss:$8 sps:$4 sm:$0xff] (!%p238_p0)   ;;  %680 = vmatprep.mubr.bf16.mxu1 (!%p238_p0), %v1807_v52 }
  0x21   : > { %v1511_v12 = vld [vmem:[%s2261_s6 + $0x64] ss:$8 sps:$4 sm:$0xff] (!%p238_p0)   ;;  %v1513_v13 = vld [vmem:[%s2261_s6 + $0x60] ss:$8 sps:$4 sm:$0xff] (!%p238_p0)   ;;  %v1514_v14 = vld [vmem:[%s2261_s6 + $0x74] ss:$8 sps:$4 sm:$0xff] (!%p238_p0)  }
  0x22   : > { %511 = vmatpush1.bf16.msra.mxu0 (!%p238_p0), %v1498_v3  ;;  %v1516_v18 = vld [vmem:[%s2261_s6 + $0x70] ss:$8 sps:$4 sm:$0xff] (!%p238_p0)   ;;  %v1517_v19 = vld [vmem:[%s2261_s6 + $0x84] ss:$8 sps:$4 sm:$0xff] (!%p238_p0)   ;;  %v1519_v20 = vld [vmem:[%s2261_s6 + $0x80] ss:$8 sps:$4 sm:$0xff] (!%p238_p0)  }
  0x23   : > { %512 = vmatprep.subr.bf16.mxu0 (!%p238_p0), %v1499_v4  ;;  %v1520_v21 = vld [vmem:[%s2261_s6 + $0x94] ss:$8 sps:$4 sm:$0xff] (!%p238_p0)   ;;  %v1522_v22 = vld [vmem:[%s2261_s6 + $0x90] ss:$8 sps:$4 sm:$0xff] (!%p238_p0)   ;;  %v1523_v23 = vld [vmem:[%s2261_s6 + $0xa4] ss:$8 sps:$4 sm:$0xff] (!%p238_p0)  }
  0x24   : > { %s2283_s15 = smov (!%p274_p1, %s1250_s15), 3  ;;  %v1525_v24 = vld [vmem:[%s2261_s6 + $0xa0] ss:$8 sps:$4 sm:$0xff]   ;;  %v1526_v25 = vld [vmem:[%s2261_s6 + $0xb4] ss:$8 sps:$4 sm:$0xff]   ;;  %s2083_s29 = sld [smem:[#allocation4]] }
  0x25   : > { %s1370_s17 = sshll.u32 %s2283_s15, 3  ;;  %v1528_v26 = vld [vmem:[%s2261_s6 + $0xb0] ss:$8 sps:$4 sm:$0xff]   ;;  %v1529_v27 = vld [vmem:[%s2261_s6 + $0xc4] ss:$8 sps:$4 sm:$0xff]  }
  0x26   : > { %513 = vmatpush1.bf16.msra.mxu0 %v1501_v5  ;;  %s1956_s27 = scalar_lea.vmem %s2257_s2, %s1370_s17  ;;  %s284_s30 = scalar_lea.vmem %s2258_s3, %s1370_s17  ;;  %v1531_v28 = vld [vmem:[%s2261_s6 + $0xc0] ss:$8 sps:$4 sm:$0xff]   ;;  %v1532_v29 = vld [vmem:[%s2261_s6 + $0xd4] ss:$8 sps:$4 sm:$0xff]   ;;  %v1534_v30 = vld [vmem:[%s2261_s6 + $0xd0] ss:$8 sps:$4 sm:$0xff]  }
  0x27   : > { %514 = vmatprep.subr.bf16.mxu0 %v1502_v6  ;;  %v1971_v15 = vld [vmem:[%s1956_s27 + $0x4] ss:$8 sps:$4 sm:$0xff]   ;;  %v1537_v32 = vld [vmem:[%s2261_s6 + $0xe0] ss:$8 sps:$4 sm:$0xff]   ;;  %v1538_v33 = vld [vmem:[%s2261_s6 + $0xf4] ss:$8 sps:$4 sm:$0xff]   ;;  %v693_v6 = vlaneseq }
  0x28   : > { %v1973_v16 = vld [vmem:[%s284_s30] sm:$0xff]  ;;  %v1975_v17 = vld [vmem:[%s284_s30 + $0x8] sm:$0xff]  ;;  %540 = vmatprep.mubr.bf16.mxu0 %v1971_v15  ;;  %v1540_v34 = vld [vmem:[%s2261_s6 + $0xf0] ss:$8 sps:$4 sm:$0xff]  }
  0x29   : > { %v1535_v31 = vld [vmem:[%s2261_s6 + $0xe4] ss:$8 sps:$4 sm:$0xff]   ;;  %v2030_v35 = vld [vmem:[%s1956_s27] ss:$8 sps:$4 sm:$0xff]   ;;  %v1547_v38 = vld [vmem:[%s2262_s7 + $0x14] ss:$8 sps:$4 sm:$0xff]  }
  0x2a   : > { %515 = vmatpush1.bf16.msra.mxu0 %v1504_v7  ;;  %v1544_v36 = vld [vmem:[%s2262_s7 + $0x4] ss:$8 sps:$4 sm:$0xff]   ;;  %v1546_v37 = vld [vmem:[%s2262_s7] ss:$8 sps:$4 sm:$0xff]   ;;  %v1549_v39 = vld [vmem:[%s2262_s7 + $0x10] ss:$8 sps:$4 sm:$0xff]  }
  0x2b   : > { %516 = vmatprep.subr.bf16.mxu0 %v1505_v8  ;;  %648 = vmatprep.subr.bf16.mxu1 %v1544_v36  ;;  %v1550_v40 = vld [vmem:[%s2262_s7 + $0x24] ss:$8 sps:$4 sm:$0xff]   ;;  %v1552_v41 = vld [vmem:[%s2262_s7 + $0x20] ss:$8 sps:$4 sm:$0xff]   ;;  %v1553_v42 = vld [vmem:[%s2262_s7 + $0x34] ss:$8 sps:$4 sm:$0xff]  }
  0x2c   : > { %649 = vmatpush1.bf16.msra.mxu1 %v1546_v37  ;;  %v1555_v43 = vld [vmem:[%s2262_s7 + $0x30] ss:$8 sps:$4 sm:$0xff]   ;;  %v1556_v44 = vld [vmem:[%s2262_s7 + $0x44] ss:$8 sps:$4 sm:$0xff]   ;;  %v1558_v45 = vld [vmem:[%s2262_s7 + $0x40] ss:$8 sps:$4 sm:$0xff]  }
  0x2d   : > { %650 = vmatprep.subr.bf16.mxu1 %v1547_v38  ;;  %v1559_v46 = vld [vmem:[%s2262_s7 + $0x54] ss:$8 sps:$4 sm:$0xff]   ;;  %v1561_v47 = vld [vmem:[%s2262_s7 + $0x50] ss:$8 sps:$4 sm:$0xff]   ;;  %v1562_v48 = vld [vmem:[%s2262_s7 + $0x64] ss:$8 sps:$4 sm:$0xff]  }
  0x2e   : > { %517 = vmatpush1.bf16.msra.mxu0 %v1507_v9  ;;  %v1564_v49 = vld [vmem:[%s2262_s7 + $0x60] ss:$8 sps:$4 sm:$0xff]   ;;  %v1565_v50 = vld [vmem:[%s2262_s7 + $0x74] ss:$8 sps:$4 sm:$0xff]   ;;  %v1567_v51 = vld [vmem:[%s2262_s7 + $0x70] ss:$8 sps:$4 sm:$0xff]  }
  0x2f   : > { %518 = vmatprep.subr.bf16.mxu0 %v1508_v10  ;;  %v2081_v7 = vand.u32 127, %v693_v6  ;;  %s2086_s27 = scalar_lea.vmem [#allocation5], %s1917_s25  ;;  %p1307_p2 = scmp.le.s32.totalorder %s2083_s29, 0 }
  0x30   : > { %651 = vmatpush1.bf16.msra.mxu1 %v1549_v39  ;;  %s2105_s25 = smov (!%p1307_p2), 0  }
  0x31   : > { %652 = vmatprep.subr.bf16.mxu1 %v1550_v40 }
  0x32   : > { %519 = vmatpush1.bf16.msra.mxu0 %v1510_v11 }
  0x33   : > { %520 = vmatprep.subr.bf16.mxu0 %v1511_v12 }
  0x34   : > { %653 = vmatpush1.bf16.msra.mxu1 %v1552_v41 }
  0x35   : > { %654 = vmatprep.subr.bf16.mxu1 %v1553_v42 }
  0x36   : > { %521 = vmatpush1.bf16.msra.mxu0 %v1513_v13 }
  0x37   : > { %522 = vmatprep.subr.bf16.mxu0 %v1514_v14 }
  0x38   : > { %655 = vmatpush1.bf16.msra.mxu1 %v1555_v43 }
  0x39   : > { %656 = vmatprep.subr.bf16.mxu1 %v1556_v44 }
  0x3a   : > { %523 = vmatpush1.bf16.msra.mxu0 %v1516_v18 }
  0x3b   : > { %524 = vmatprep.subr.bf16.mxu0 %v1517_v19 }
  0x3c   : > { %657 = vmatpush1.bf16.msra.mxu1 %v1558_v45 }
  0x3d   : > { %658 = vmatprep.subr.bf16.mxu1 %v1559_v46 }
  0x3e   : > { %525 = vmatpush1.bf16.msra.mxu0 %v1519_v20 }
  0x3f   : > { %526 = vmatprep.subr.bf16.mxu0 %v1520_v21 }
  0x40   : > { %659 = vmatpush1.bf16.msra.mxu1 %v1561_v47 }
  0x41   : > { %660 = vmatprep.subr.bf16.mxu1 %v1562_v48 }
  0x42   : > { %527 = vmatpush1.bf16.msra.mxu0 %v1522_v22 }
  0x43   : > { %528 = vmatprep.subr.bf16.mxu0 %v1523_v23 }
  0x44   : > { %661 = vmatpush1.bf16.msra.mxu1 %v1564_v49 }
  0x45   : > { %662 = vmatprep.subr.bf16.mxu1 %v1565_v50 }
  0x46   : > { %529 = vmatpush1.bf16.msra.mxu0 %v1525_v24 }
  0x47   : > { %530 = vmatprep.subr.bf16.mxu0 %v1526_v25 }
  0x48   : > { %663 = vmatpush1.bf16.msra.mxu1 %v1567_v51 }
  0x4a   : > { %531 = vmatpush1.bf16.msra.mxu0 %v1528_v26 }
  0x4b   : > { %532 = vmatprep.subr.bf16.mxu0 %v1529_v27 }
  0x4e   : > { %533 = vmatpush1.bf16.msra.mxu0 %v1531_v28 }
  0x4f   : > { %534 = vmatprep.subr.bf16.mxu0 %v1532_v29 }
  0x52   : > { %535 = vmatpush1.bf16.msra.mxu0 %v1534_v30 }
  0x53   : > { %536 = vmatprep.subr.bf16.mxu0 %v1535_v31 }
  0x56   : > { %537 = vmatpush1.bf16.msra.mxu0 %v1537_v32 }
  0x57   : > { %538 = vmatprep.subr.bf16.mxu0 %v1538_v33 }
  0x5a   : > { %539 = vmatpush1.bf16.msra.mxu0 %v1540_v34 }
  0x5d   : > { %541 = vmatmul.mubr.bf16.vlgmr.msra.gmra.mrb[0].mxu0 %v2030_v35 }
 0x130   : > { %v542_v53 = vpop.f32.mrb[0].mxu0 }
 0x131   : > { %v1289_v54 = vmul.f32 -1.442695, %v542_v53  ;;  %v544_v55 = vpop.f32.mrb[1].mxu0 }
 0x132   : > { %v546_v56 = vpop.f32.mrb[2].mxu0 }
 0x133   : > { %1568 = vpow2.f32 %v1289_v54  ;;  %v1290_v57 = vmul.f32 -1.442695, %v546_v56  ;;  %v548_v58 = vpop.f32.mrb[3].mxu0 }
 0x135   : > { %1570 = vpow2.f32 %v1290_v57 }
 0x13d   : > { %v1569_v59 = vpop.eup %1568 }
 0x13e   : > { %v557_v60 = vadd.f32 1.0, %v1569_v59 }
 0x13f   : > { %v1571_v61 = vpop.eup %1570 }
 0x140   : > { %1572 = vrcp.f32 %v557_v60  ;;  %v558_v62 = vadd.f32 1.0, %v1571_v61 }
 0x142   : > { %1574 = vrcp.f32 %v558_v62 }
 0x14a   : > { %v1573_v63 = vpop.eup %1572 }
 0x14b   : > { %v563_v0 = vmul.f32 %v1573_v63, %v542_v53 }
 0x14c   : > { %v1575_v1 = vpop.eup %1574 }
 0x14d   : > { %v565_v2 = vmul.f32 %v563_v0, %v544_v55  ;;  %v564_v3 = vmul.f32 %v1575_v1, %v546_v56 }
 0x14f   : > { %v566_v4 = vmul.f32 %v564_v3, %v548_v58 }
 0x151   : > { %v567_v5 = vpack.c.bf16 %v566_v4, %v565_v2 }
 0x153   : > { %681 = vmatmul.mubr.bf16.vlgmr.msra.gmra.mrb[0].mxu1 %v567_v5 }
 0x224   : > { %1207 = sbr.rel (%p1307_p2) target bundleno = 1094 (0x446), region = 85 }
 0x226   : > { %v682_v8 = vpop.f32.mrb[0].mxu1  }
 0x227   : > { %v684_v9 = vpop.f32.mrb[1].mxu1   ;;  %v2269_v18 = vmov %v682_v8 }
 0x228   : > { %v686_v10 = vpop.f32.mrb[2].mxu1   ;;  %v2268_v14 = vmov %v684_v9 }
 0x229   : > { %v688_v11 = vpop.f32.mrb[3].mxu1   ;;  %v2267_v13 = vmov %v686_v10 }
 0x22a   : > { %v2266_v12 = vmov %v688_v11 }
 0x22b LB: >> { %964 = vmatprep.mubr.bf16.mxu0 %v1971_v15  ;;  %s2124_s9 = sld [smem:[#allocation3 + %s1788_s25]]  ;;  %vm711_vm0 = vcmask 64512   ;;  %v1808_v14 = vmov 0   ;;  %s699_s25 = sadd.s32 1, %s1788_s25   ;;  %s1788_s25 = sphi %s2105_s25, %s699_s25   ;;  %v1784_v8 = vphi %v682_v8, %v2273_v8   ;;  %v1780_v9 = vphi %v684_v9, %v2272_v9   ;;  %v1776_v10 = vphi %v686_v10, %v2271_v10   ;;  %v1772_v11 = vphi %v688_v11, %v2270_v11  }
 0x22c   : >> { %1106 = vmatprep.mubr.bf16.mxu1 %v1808_v14  ;;  %p698_p3 = scmp.ge.s32.totalorder %s699_s25, %s2083_s29 }
 0x231   : >> { %s1371_s30 = sshll.u32 %s2124_s9, 8  ;;  %v707_v19 = vstv %s2124_s9  ;;  %s1372_s18 = sshll.u32 %s2124_s9, 7 }
 0x232   : >> { %s2131_s11 = scalar_lea.vmem %s2259_s4, %s1371_s30  ;;  %vm708_vm1 = vcmp.eq.s32.totalorder %v2081_v7, %v707_v19  ;;  %s755_s24 = scalar_lea.vmem %s2260_s5, %s1372_s18 }
 0x233   : >> { %v1576_v20 = vld [vmem:[%s2131_s11 + $0x4] ss:$8 sps:$4 sm:$0xff]   ;;  %v709_v21 = vsel %vm708_vm1, %v1973_v16, 0.0  ;;  %v710_v22 = vsel %vm708_vm1, %v1975_v17, 0.0  ;;  %v1578_v23 = vld [vmem:[%s2131_s11] ss:$8 sps:$4 sm:$0xff]  }
 0x234   : >> { %v712_v24 = vsel %vm711_vm0, %v709_v21, 0.0  ;;  %932 = vmatprep.subr.bf16.mxu0 %v1576_v20  ;;  %v1579_v25 = vld [vmem:[%s2131_s11 + $0x14] ss:$8 sps:$4 sm:$0xff]   ;;  %v1581_v26 = vld [vmem:[%s2131_s11 + $0x10] ss:$8 sps:$4 sm:$0xff]   ;;  %v715_v27 = vsel %vm711_vm0, %v710_v22, 0.0 }
 0x235   : >> { %713 = vadd.xlane.f32.xlu0 %v712_v24  ;;  %933 = vmatpush1.bf16.msra.mxu0 %v1578_v23  ;;  %v1582_v28 = vld [vmem:[%s2131_s11 + $0x24] ss:$8 sps:$4 sm:$0xff]   ;;  %v1584_v29 = vld [vmem:[%s2131_s11 + $0x20] ss:$8 sps:$4 sm:$0xff]   ;;  %v1585_v30 = vld [vmem:[%s2131_s11 + $0x34] ss:$8 sps:$4 sm:$0xff]  }
 0x236   : >> { %934 = vmatprep.subr.bf16.mxu0 %v1579_v25  ;;  %v1587_v31 = vld [vmem:[%s2131_s11 + $0x30] ss:$8 sps:$4 sm:$0xff]   ;;  %v1588_v32 = vld [vmem:[%s2131_s11 + $0x44] ss:$8 sps:$4 sm:$0xff]   ;;  %v1590_v33 = vld [vmem:[%s2131_s11 + $0x40] ss:$8 sps:$4 sm:$0xff]  }
 0x237   : >> { %v1591_v34 = vld [vmem:[%s2131_s11 + $0x54] ss:$8 sps:$4 sm:$0xff]   ;;  %v1593_v36 = vld [vmem:[%s2131_s11 + $0x50] ss:$8 sps:$4 sm:$0xff]   ;;  %v1594_v37 = vld [vmem:[%s2131_s11 + $0x64] ss:$8 sps:$4 sm:$0xff]  }
 0x238   : >> { %v1596_v38 = vld [vmem:[%s2131_s11 + $0x60] ss:$8 sps:$4 sm:$0xff]   ;;  %v1597_v39 = vld [vmem:[%s2131_s11 + $0x74] ss:$8 sps:$4 sm:$0xff]   ;;  %v1599_v40 = vld [vmem:[%s2131_s11 + $0x70] ss:$8 sps:$4 sm:$0xff]  }
 0x239   : >> { %716 = vadd.xlane.f32.xlu0 %v715_v27  ;;  %935 = vmatpush1.bf16.msra.mxu0 %v1581_v26  ;;  %v1600_v41 = vld [vmem:[%s2131_s11 + $0x84] ss:$8 sps:$4 sm:$0xff]   ;;  %v1602_v42 = vld [vmem:[%s2131_s11 + $0x80] ss:$8 sps:$4 sm:$0xff]   ;;  %v1603_v43 = vld [vmem:[%s2131_s11 + $0x94] ss:$8 sps:$4 sm:$0xff]  }
 0x23a   : >> { %936 = vmatprep.subr.bf16.mxu0 %v1582_v28  ;;  %v1605_v44 = vld [vmem:[%s2131_s11 + $0x90] ss:$8 sps:$4 sm:$0xff]   ;;  %v1606_v45 = vld [vmem:[%s2131_s11 + $0xa4] ss:$8 sps:$4 sm:$0xff]   ;;  %v1608_v46 = vld [vmem:[%s2131_s11 + $0xa0] ss:$8 sps:$4 sm:$0xff]  }
 0x23b   : >> { %v1609_v47 = vld [vmem:[%s2131_s11 + $0xb4] ss:$8 sps:$4 sm:$0xff]   ;;  %v1611_v48 = vld [vmem:[%s2131_s11 + $0xb0] ss:$8 sps:$4 sm:$0xff]   ;;  %v1612_v49 = vld [vmem:[%s2131_s11 + $0xc4] ss:$8 sps:$4 sm:$0xff]  }
 0x23c   : >> { %v1614_v50 = vld [vmem:[%s2131_s11 + $0xc0] ss:$8 sps:$4 sm:$0xff]   ;;  %v1615_v51 = vld [vmem:[%s2131_s11 + $0xd4] ss:$8 sps:$4 sm:$0xff]   ;;  %v1617_v52 = vld [vmem:[%s2131_s11 + $0xd0] ss:$8 sps:$4 sm:$0xff]  }
 0x23d   : >> { %937 = vmatpush1.bf16.msra.mxu0 %v1584_v29  ;;  %v1618_v53 = vld [vmem:[%s2131_s11 + $0xe4] ss:$8 sps:$4 sm:$0xff]   ;;  %v1620_v54 = vld [vmem:[%s2131_s11 + $0xe0] ss:$8 sps:$4 sm:$0xff]   ;;  %v1621_v55 = vld [vmem:[%s2131_s11 + $0xf4] ss:$8 sps:$4 sm:$0xff]  }
 0x23e   : >> { %938 = vmatprep.subr.bf16.mxu0 %v1585_v30  ;;  %v1623_v56 = vld [vmem:[%s2131_s11 + $0xf0] ss:$8 sps:$4 sm:$0xff]   ;;  %v1624_v57 = vld [vmem:[%s755_s24 + $0x4] ss:$8 sps:$4 sm:$0xff]   ;;  %v1626_v58 = vld [vmem:[%s755_s24] ss:$8 sps:$4 sm:$0xff]  }
 0x23f   : >> { %1074 = vmatprep.subr.bf16.mxu1 %v1624_v57  ;;  %v1627_v59 = vld [vmem:[%s755_s24 + $0x14] ss:$8 sps:$4 sm:$0xff]   ;;  %v1629_v60 = vld [vmem:[%s755_s24 + $0x10] ss:$8 sps:$4 sm:$0xff]   ;;  %v1630_v61 = vld [vmem:[%s755_s24 + $0x24] ss:$8 sps:$4 sm:$0xff]  }
 0x240   : >> { %1075 = vmatpush1.bf16.msra.mxu1 %v1626_v58  ;;  %v1632_v62 = vld [vmem:[%s755_s24 + $0x20] ss:$8 sps:$4 sm:$0xff]   ;;  %v1633_v63 = vld [vmem:[%s755_s24 + $0x34] ss:$8 sps:$4 sm:$0xff]   ;;  %v1635_v0 = vld [vmem:[%s755_s24 + $0x30] ss:$8 sps:$4 sm:$0xff]  }
 0x241   : >> { %939 = vmatpush1.bf16.msra.mxu0 %v1587_v31  ;;  %1076 = vmatprep.subr.bf16.mxu1 %v1627_v59  ;;  %v1636_v1 = vld [vmem:[%s755_s24 + $0x44] ss:$8 sps:$4 sm:$0xff]   ;;  %v1638_v2 = vld [vmem:[%s755_s24 + $0x40] ss:$8 sps:$4 sm:$0xff]   ;;  %v1639_v3 = vld [vmem:[%s755_s24 + $0x54] ss:$8 sps:$4 sm:$0xff]  }
 0x242   : >> { %940 = vmatprep.subr.bf16.mxu0 %v1588_v32  ;;  %v1641_v4 = vld [vmem:[%s755_s24 + $0x50] ss:$8 sps:$4 sm:$0xff]   ;;  %v1642_v5 = vld [vmem:[%s755_s24 + $0x64] ss:$8 sps:$4 sm:$0xff]   ;;  %v1644_v6 = vld [vmem:[%s755_s24 + $0x60] ss:$8 sps:$4 sm:$0xff]  }
 0x243   : >> { %v1645_v12 = vld [vmem:[%s755_s24 + $0x74] ss:$8 sps:$4 sm:$0xff]   ;;  %v1647_v13 = vld [vmem:[%s755_s24 + $0x70] ss:$8 sps:$4 sm:$0xff]  }
 0x244   : >> { %1077 = vmatpush1.bf16.msra.mxu1 %v1629_v60 }
 0x245   : >> { %941 = vmatpush1.bf16.msra.mxu0 %v1590_v33  ;;  %1078 = vmatprep.subr.bf16.mxu1 %v1630_v61 }
 0x246   : >> { %942 = vmatprep.subr.bf16.mxu0 %v1591_v34 }
 0x248   : >> { %1079 = vmatpush1.bf16.msra.mxu1 %v1632_v62 }
 0x249   : >> { %943 = vmatpush1.bf16.msra.mxu0 %v1593_v36  ;;  %1080 = vmatprep.subr.bf16.mxu1 %v1633_v63 }
 0x24a   : >> { %944 = vmatprep.subr.bf16.mxu0 %v1594_v37 }
 0x24c   : >> { %1081 = vmatpush1.bf16.msra.mxu1 %v1635_v0 }
 0x24d   : >> { %945 = vmatpush1.bf16.msra.mxu0 %v1596_v38  ;;  %1082 = vmatprep.subr.bf16.mxu1 %v1636_v1 }
 0x24e   : >> { %946 = vmatprep.subr.bf16.mxu0 %v1597_v39 }
 0x250   : >> { %1083 = vmatpush1.bf16.msra.mxu1 %v1638_v2 }
 0x251   : >> { %947 = vmatpush1.bf16.msra.mxu0 %v1599_v40  ;;  %1084 = vmatprep.subr.bf16.mxu1 %v1639_v3 }
 0x252   : >> { %948 = vmatprep.subr.bf16.mxu0 %v1600_v41 }
 0x254   : >> { %1085 = vmatpush1.bf16.msra.mxu1 %v1641_v4 }
 0x255   : >> { %949 = vmatpush1.bf16.msra.mxu0 %v1602_v42  ;;  %1086 = vmatprep.subr.bf16.mxu1 %v1642_v5 }
 0x256   : >> { %950 = vmatprep.subr.bf16.mxu0 %v1603_v43 }
 0x258   : >> { %1087 = vmatpush1.bf16.msra.mxu1 %v1644_v6 }
 0x259   : >> { %951 = vmatpush1.bf16.msra.mxu0 %v1605_v44  ;;  %1088 = vmatprep.subr.bf16.mxu1 %v1645_v12 }
 0x25a   : >> { %952 = vmatprep.subr.bf16.mxu0 %v1606_v45 }
 0x25c   : >> { %1089 = vmatpush1.bf16.msra.mxu1 %v1647_v13 }
 0x25d   : >> { %953 = vmatpush1.bf16.msra.mxu0 %v1608_v46 }
 0x25e   : >> { %954 = vmatprep.subr.bf16.mxu0 %v1609_v47 }
 0x261   : >> { %955 = vmatpush1.bf16.msra.mxu0 %v1611_v48 }
 0x262   : >> { %956 = vmatprep.subr.bf16.mxu0 %v1612_v49 }
 0x265   : >> { %957 = vmatpush1.bf16.msra.mxu0 %v1614_v50 }
 0x266   : >> { %958 = vmatprep.subr.bf16.mxu0 %v1615_v51 }
 0x269   : >> { %959 = vmatpush1.bf16.msra.mxu0 %v1617_v52 }
 0x26a   : >> { %960 = vmatprep.subr.bf16.mxu0 %v1618_v53 }
 0x26d   : >> { %961 = vmatpush1.bf16.msra.mxu0 %v1620_v54 }
 0x26e   : >> { %962 = vmatprep.subr.bf16.mxu0 %v1621_v55 }
 0x271   : >> { %963 = vmatpush1.bf16.msra.mxu0 %v1623_v56 }
 0x274   : >> { %965 = vmatmul.mubr.bf16.vlgmr.msra.gmra.mrb[0].mxu0 %v2030_v35 }
 0x2c2   : >> { %v714_v28 = vpop.xlane.xlu0 %713 }
 0x2c6   : >> { %v717_v34 = vpop.xlane.xlu0 %716 }
 0x347   : >> { %v966_v18 = vpop.f32.mrb[0].mxu0 }
 0x348   : >> { %v1344_v19 = vmul.f32 -1.442695, %v966_v18  ;;  %v968_v20 = vpop.f32.mrb[1].mxu0 }
 0x349   : >> { %v970_v21 = vpop.f32.mrb[2].mxu0 }
 0x34a   : >> { %1648 = vpow2.f32 %v1344_v19  ;;  %v1345_v22 = vmul.f32 -1.442695, %v970_v21  ;;  %v972_v23 = vpop.f32.mrb[3].mxu0 }
 0x34c   : >> { %1650 = vpow2.f32 %v1345_v22 }
 0x354   : >> { %v1649_v24 = vpop.eup %1648 }
 0x355   : >> { %v981_v25 = vadd.f32 1.0, %v1649_v24 }
 0x356   : >> { %v1651_v26 = vpop.eup %1650 }
 0x357   : >> { %1652 = vrcp.f32 %v981_v25  ;;  %v982_v27 = vadd.f32 1.0, %v1651_v26 }
 0x359   : >> { %1654 = vrcp.f32 %v982_v27 }
 0x361   : >> { %v1653_v29 = vpop.eup %1652 }
 0x362   : >> { %v987_v30 = vmul.f32 %v1653_v29, %v966_v18 }
 0x363   : >> { %v1655_v31 = vpop.eup %1654 }
 0x364   : >> { %v989_v32 = vmul.f32 %v987_v30, %v968_v20  ;;  %v988_v33 = vmul.f32 %v1655_v31, %v970_v21 }
 0x366   : >> { %v990_v36 = vmul.f32 %v988_v33, %v972_v23  ;;  %v991_v37 = vmul.f32 %v989_v32, %v714_v28 }
 0x368   : >> { %v992_v38 = vmul.f32 %v990_v36, %v717_v34 }
 0x36a   : >> { %v993_v39 = vpack.c.bf16 %v992_v38, %v991_v37 }
 0x36c   : >> { %1107 = vmatmul.mubr.bf16.vlgmr.msra.gmra.mrb[0].mxu1 %v993_v39 }
 0x43f   : >> { %v1108_v40 = vpop.f32.mrb[0].mxu1  ;;  %701 = sbr.rel (!%p698_p3) target bundleno = 555 (0x22b), region = 91 }
 0x440   : >> { %v1117_v41 = vadd.f32 %v1784_v8, %v1108_v40   ;;  %v1110_v42 = vpop.f32.mrb[1].mxu1 }
 0x441   : >> { %v1118_v43 = vadd.f32 %v1780_v9, %v1110_v42   ;;  %v1112_v44 = vpop.f32.mrb[2].mxu1 }
 0x442   : >> { %v1119_v45 = vadd.f32 %v1776_v10, %v1112_v44   ;;  %v1114_v46 = vpop.f32.mrb[3].mxu1  ;;  %v2273_v8 = vmov %v1117_v41  ;;  %v2277_v18 = vmov (%p698_p3), %v1117_v41 }
 0x443   : >> { %v1120_v47 = vadd.f32 %v1772_v11, %v1114_v46   ;;  %v2272_v9 = vmov %v1118_v43  ;;  %v2276_v14 = vmov (%p698_p3), %v1118_v43 }
 0x444   : >> { %v2271_v10 = vmov %v1119_v45  ;;  %v2275_v13 = vmov (%p698_p3), %v1119_v45 }
 0x445   : >> { %v2270_v11 = vmov %v1120_v47  ;;  %v2274_v12 = vmov (%p698_p3), %v1120_v47 }
 0x446 PF: > { %v1373_v8 = vpack.c.bf16 %v1800_v14, %v1804_v18  ;;  %v1374_v15 = vpack.c.bf16 %v1792_v12, %v1796_v13  ;;  %s1376_s26 = sshll.u32 %s1884_s14, 8  ;;  %s1150_s9 = sshll.u32 %s2086_s27, 4  ;;  %v1804_v18 = vphi %v2269_v18, %v2277_v18   ;;  %v1800_v14 = vphi %v2268_v14, %v2276_v14   ;;  %v1796_v13 = vphi %v2267_v13, %v2275_v13   ;;  %v1792_v12 = vphi %v2266_v12, %v2274_v12   ;;  %s2210_s9 = int_to_ptr.vmem [resolvable:$true] %s1150_s9 }
 0x447   : > { %s2205_s25 = scalar_lea.hbm %s2263_s8, %s1376_s26  ;;  %s2214_s30 = scalar_lea.sflag [#allocation6], %s270_s22 }
 0x448   : > { %1133 = vst [vmem:[%s2086_s27] sm:$0xff] %v1373_v8  ;;  %1134 = vst [vmem:[%s2086_s27 + $0x8] sm:$0xff] %v1374_v15  ;;  %s1668_s10 = scalar_lea.vmem %s2210_s9, 256  ;;  %s1809_s14 = smov [#allocation5]  }
 0x449   : > { %p1669_p4 = scmp.ne.s32.totalorder %s2210_s9, %s1668_s10  ;;  %s1672_s15 = sshll.u32 %s1809_s14, 4  ;;  %s1673_s15 = int_to_ptr.vmem [resolvable:$false] %s1672_s15 }
 0x44a   : > { %s1674_s11 = scalar_lea.vmem %s1673_s15, 512  ;;  %p1675_p7 = scmp.lt.s32.totalorder %s2210_s9, %s1673_s15 }
 0x44b   : > { %p1670_p5 = pnand %p1669_p4, %p1901_p10  ;;  %p1676_p8 = scmp.lt.s32.totalorder %s1674_s11, %s1668_s10 }
 0x44d   : > { %p1671_p6 = pneg %p1670_p5  ;;  %p1677_p9 = por %p1676_p8, %p1675_p7 }
 0x44f   : > { %p1678_p12 = pnand %p1677_p9, %p1671_p6 }
 0x451   : > { %1681 = shalt.err (!%p1678_p12)
}
 0x452   : > { %s1682_s22 = scalar_lea.hbm %s2205_s25, 256  ;;  %s1686_s23 = scalar_lea.hbm %s2263_s8, 512 }
 0x453   : > { %p1683_p13 = scmp.ne.s32.totalorder %s2205_s25, %s1682_s22  ;;  %p1687_p2 = scmp.lt.u32.totalorder %s2205_s25, %s2263_s8 }
 0x454   : > { %p1688_p3 = scmp.lt.u32.totalorder %s1686_s23, %s1682_s22  ;;  %p1690_p5 = scmp.lt.u32.totalorder %s1682_s22, %s2205_s25 }
 0x455   : > { %p1684_p0 = pnand %p1683_p13, %p1901_p10 }
 0x456   : > { %p1689_p4 = por %p1688_p3, %p1687_p2 }
 0x457   : > { %p1685_p1 = pneg %p1684_p0 }
 0x458   : > { %p1691_p6 = por %p1690_p5, %p1689_p4 }
 0x45a   : > { %p1692_p7 = pnand %p1691_p6, %p1685_p1 }
 0x45c   : > { %1695 = shalt.err (!%p1692_p7)
}
 0x45d   : > { %s1810_s26 = smov 128   ;;  %s1811_s28 = smov 8  }
 0x45e   : > { %1377 = dma.vmem_to_hbm [thread:$0]  (%p1901_p10), %s2210_s9, 256, %s2205_s25, %s2214_s30, %s1810_s26, %s1810_s26, %s1811_s28  }
 0x45f PF: > { %p1383_p8 = scmp.ge.s32.totalorder %s1768_s13, 2  ;;  %s1165_s29 = sand.u32 1, %s1756_s0  }
 0x460   : > { %s1166_s10 = scalar_lea.sflag [#allocation6], %s1165_s29 }
 0x461   : > { %p1380_p9 = pnand %p1383_p8, %p1905_p11 }
 0x463   : > { %1751 = dma.done.wait (!%p1380_p9), %s1166_s10, 256  }
 0x464   : > { %1753 = vsyncadd (!%p1380_p9), %s1166_s10, 4294967040  ;;  %p25_p12 = scmp.ge.s32.totalorder %s1888_s16, 4   ;;  %s2278_s0 = smov %s1760_s12 }
 0x465   : > { %s2279_s12 = smov %s1764_s1  ;;  %s2280_s1 = smov %s1899_s19 }
 0x466   : > { %s2281_s13 = smov %s1888_s16  ;;  %27 = sbr.rel (!%p25_p12) target bundleno = 18 (0x12), region = 102 }
 0x46d   :  { %1171 = vsyncpa [#allocation6], 1 }
 0x46e   :  { %1173 = vsyncpa [#allocation6 + $0x1], 1 }

</bundles_post_ra>
